<compile_context>
chip_gen: v7x
topology: tpu7x:2x2x1
jax: 0.10.0
libtpu: 0.0.40
codegen_flags: <defaults>
</compile_context>

<pallas_src>
import jax
import jax.numpy as jnp
from jax.experimental import pallas as pl
from jax.experimental.pallas import tpu as pltpu

# ---- module configuration ----------------------------------------------------
HIDDEN_DIM = 32
ATTN_DIM = 8
ATTN_HEADS = 4
OUT_DIM = ATTN_DIM * ATTN_HEADS          # 32
CLAMP = 5.0
WEIGHT_FN = "softmax"
AGG = "add"                              # scatter reduce = sum
ACT = "relu"
ATTN_DROP_PROB = 0.0                     # dropout p=0 -> identity (eval semantics)

N_NODES = 8
N_EDGES = 16
N_GRAPHS = 4
GRAPHS_PER_STEP = 2                      # 2 graphs folded per grid step -> 2 steps

# ---- packed weight-slab layout (row offsets; all 8-row aligned) ---------------
W_WQKV = 0                               # rows [0, 32)   : [HID, 3*OUT]  Wq|Wk|Wv
W_BQKV = W_WQKV + HIDDEN_DIM             # row  32        : [1, 3*OUT]    0|0|bv
W_WE = W_BQKV + 8                        # rows [40, 72)  : [HID, OUT]    We
W_BE = W_WE + HIDDEN_DIM                 # row  72        : [1, OUT]      be
W_AW = W_BE + 8                          # rows [80, 112) : [OUT, OUT]    aw_rep
W_BW = W_AW + OUT_DIM                    # rows [112,144) : [OUT, OUT]    bw_bd
W_ROWS = W_BW + OUT_DIM                  # 144
W_COLS = 3 * OUT_DIM                     # 96


def _mp_kernel(x_ref, econn_ref, idx_ref, dstr_ref, w_ref, no_ref, eo_ref):
    f32 = jnp.float32

    x = x_ref[0]                 # [NF, HID]   NF = graphs_per_step * N
    econn = econn_ref[0]         # [EF, HID]   EF = graphs_per_step * E
    idx = idx_ref[0]             # [EF, 2] int32  (col 0 = dst, col 1 = src)
    dst_row = dstr_ref[0]        # [1, EF] int32

    NF = x.shape[0]
    EF = econn.shape[0]

    # ---- static slices of the packed weight slab (sublane-aligned views) ----
    w_qkv = w_ref[W_WQKV:W_WQKV + HIDDEN_DIM, :]                     # [HID, 3*OUT]
    b_qkv = w_ref[W_BQKV:W_BQKV + 1, :]                              # [1, 3*OUT]
    w_e = w_ref[W_WE:W_WE + HIDDEN_DIM, 0:OUT_DIM]                   # [HID, OUT]
    b_e = w_ref[W_BE:W_BE + 1, 0:OUT_DIM]                            # [1, OUT]
    aw_rep = w_ref[W_AW:W_AW + OUT_DIM, 0:OUT_DIM]                   # [OUT, OUT]
    bw_bd = w_ref[W_BW:W_BW + OUT_DIM, 0:OUT_DIM]                    # [OUT, OUT]

    # ---- gather / scatter one-hots built in-kernel from int indices ---------
    # (block-diagonal across the folded graphs automatically, since dst/src
    #  were offset by g*N in the wrapper; no in-kernel transpose.)
    lane_n = jax.lax.broadcasted_iota(jnp.int32, (EF, NF), 1)
    doh = (idx[:, 0:1] == lane_n).astype(f32)                        # [EF, NF] one-hot(dst)
    soh = (idx[:, 1:2] == lane_n).astype(f32)                        # [EF, NF] one-hot(src)
    sub_n = jax.lax.broadcasted_iota(jnp.int32, (NF, EF), 0)
    dohT = (sub_n == dst_row).astype(f32)                            # [NF, EF]

    # ---- fused Q|K|V projection (Q,K bias-free) + E projection --------------
    qkv = jnp.dot(x, w_qkv, preferred_element_type=f32) + b_qkv      # [NF, 3*OUT]
    eh = jnp.dot(econn, w_e, preferred_element_type=f32) + b_e       # [EF, OUT]

    # ---- per-edge gathers: Q by dst, K|V together by src --------------------
    q_dst = jnp.dot(doh, qkv[:, :OUT_DIM], preferred_element_type=f32)    # [EF, OUT]
    kv_src = jnp.dot(soh, qkv[:, OUT_DIM:], preferred_element_type=f32)   # [EF, 2*OUT]
    k_src = kv_src[:, :OUT_DIM]
    v_src = kv_src[:, OUT_DIM:]

    # ---- signed-sqrt message + edge feature + ReLU --------------------------
    msg1 = q_dst * k_src
    conn = jnp.sqrt(jnp.maximum(msg1, 0.0)) - jnp.sqrt(jnp.maximum(-msg1, 0.0)) + eh
    conn = jnp.maximum(conn, 0.0)                                    # act = relu
    eo_ref[0] = conn                                                 # batch.Eo

    # ---- head-repeated attention score (block-diag column-repeated Aw) ------
    score = jnp.dot(conn, aw_rep, preferred_element_type=f32)        # [EF, OUT]
    score = jnp.clip(score, -CLAMP, CLAMP)

    # pyg_softmax over incoming edges, normalized AFTER the scatter.
    # Max-subtraction removed: |score| <= CLAMP = 5 so exp <= e^5 in f32.
    es = jnp.exp(score)                                              # [EF, OUT]

    # One fused scatter matmul: [ denom | sum(V*es) | sum(conn*es) ].
    scat_in = jnp.concatenate([es, v_src * es, conn * es], axis=1)   # [EF, 3*OUT]
    scat = jnp.dot(dohT, scat_in, preferred_element_type=f32)        # [NF, 3*OUT]

    denom = scat[:, :OUT_DIM]
    # Zero in-degree nodes: denom ~ 1e-16 -> inv ~ 1e16, but their scattered
    # sums are exactly 0, so the products below stay 0 (matches reference).
    inv = pl.reciprocal(denom + 1e-16, approx=False)                 # [NF, OUT]
    agg = inv * scat[:, OUT_DIM:2 * OUT_DIM]                         # scatter(V*w)
    rowv = inv * scat[:, 2 * OUT_DIM:]                               # scatter(conn*w)
    # attn_dropout(p=0) == identity
    # TODO(synk): attn_drop_prob > 0 would need an in-kernel PRNG (pltpu.prng_*).
    no_ref[0] = agg + jnp.dot(rowv, bw_bd, preferred_element_type=f32)   # batch.No


def _block_diag(blocks):
    """Wrapper-side block-diagonal assembly (pure JAX, outside the kernel)."""
    r_tot = sum(b.shape[0] for b in blocks)
    c_tot = sum(b.shape[1] for b in blocks)
    out = jnp.zeros((r_tot, c_tot), blocks[0].dtype)
    r = c = 0
    for b in blocks:
        out = out.at[r:r + b.shape[0], c:c + b.shape[1]].set(b)
        r += b.shape[0]
        c += b.shape[1]
    return out


def message_passing_forward(x, econn, dst, src, params, graphs_per_step=GRAPHS_PER_STEP):
    """Batched forward over G equally-sized graphs.

    x:     [G, N, HIDDEN_DIM]   batch.x
    econn: [G, E, HIDDEN_DIM]   batch.poly_conn
    dst:   [G, E] int32         batch.poly_index[0]
    src:   [G, E] int32         batch.poly_index[1]
    Returns (No [G, N, OUT_DIM], Eo [G, E, OUT_DIM]).
    """
    G, N, HID = x.shape
    E = dst.shape[1]
    H, d = ATTN_HEADS, ATTN_DIM
    assert G % graphs_per_step == 0
    Gb = graphs_per_step
    steps = G // Gb
    NF, EF = Gb * N, Gb * E

    # ---- packed weight slab -------------------------------------------------
    w_qkv = jnp.concatenate([params["Wq"], params["Wk"], params["Wv"]], axis=1)   # [HID, 3*OUT]
    b_qkv_row = jnp.concatenate(
        [jnp.zeros((2 * OUT_DIM,), jnp.float32), params["bv"]])                   # [3*OUT]
    # Block-diagonal, head-repeated Aw: aw_rep[h*d+i, h*d+j] = Aw[i, h, 0].
    aw_rep = _block_diag(
        [jnp.broadcast_to(params["Aw"][:, h, :], (d, d)) for h in range(H)])      # [OUT, OUT]
    # Block-diagonal BW: bw_bd[h*d+i, h*d+j] = BW[i, h, j].
    bw_bd = _block_diag([params["BW"][:, h, :] for h in range(H)])                # [OUT, OUT]

    wslab = jnp.zeros((W_ROWS, W_COLS), jnp.float32)
    wslab = wslab.at[W_WQKV:W_WQKV + HIDDEN_DIM, :].set(w_qkv)
    wslab = wslab.at[W_BQKV, :].set(b_qkv_row)
    wslab = wslab.at[W_WE:W_WE + HIDDEN_DIM, :OUT_DIM].set(params["We"])
    wslab = wslab.at[W_BE, :OUT_DIM].set(params["be"])
    wslab = wslab.at[W_AW:W_AW + OUT_DIM, :OUT_DIM].set(aw_rep)
    wslab = wslab.at[W_BW:W_BW + OUT_DIM, :OUT_DIM].set(bw_bd)

    # ---- fold Gb graphs per grid step; offset indices by g*N -----------------
    x_f = x.reshape(steps, NF, HID)
    e_f = econn.reshape(steps, EF, HID)
    off = (jnp.arange(Gb, dtype=jnp.int32) * N)[None, :, None]                    # [1, Gb, 1]
    dst_f = (dst.reshape(steps, Gb, E).astype(jnp.int32) + off).reshape(steps, EF)
    src_f = (src.reshape(steps, Gb, E).astype(jnp.int32) + off).reshape(steps, EF)
    idx_cols = jnp.stack([dst_f, src_f], axis=-1)                                 # [steps, EF, 2]
    dst_row = dst_f.reshape(steps, 1, EF)                                         # [steps, 1, EF]

    gmap = lambda s: (s, 0, 0)       # per-step blocks
    wmap = lambda s: (0, 0)          # weight slab: same full block every step

    in_specs = [
        pl.BlockSpec((1, NF, HID), gmap),            # x (folded)
        pl.BlockSpec((1, EF, HID), gmap),            # econn (folded)
        pl.BlockSpec((1, EF, 2), gmap),              # dst|src columns (packed)
        pl.BlockSpec((1, 1, EF), gmap),              # dst row layout
        pl.BlockSpec((W_ROWS, W_COLS), wmap),        # packed weight slab
    ]
    out_specs = (pl.BlockSpec((1, NF, OUT_DIM), gmap),
                 pl.BlockSpec((1, EF, OUT_DIM), gmap))
    out_shape = (jax.ShapeDtypeStruct((steps, NF, OUT_DIM), jnp.float32),
                 jax.ShapeDtypeStruct((steps, EF, OUT_DIM), jnp.float32))

    no, eo = pl.pallas_call(
        _mp_kernel,
        grid=(steps,),
        in_specs=in_specs,
        out_specs=out_specs,
        out_shape=out_shape,
        compiler_params=pltpu.CompilerParams(
            dimension_semantics=("parallel",)),
    )(x_f, e_f, idx_cols, dst_row, wslab)

    return no.reshape(G, N, OUT_DIM), eo.reshape(G, E, OUT_DIM)


def _reference_forward(x, econn, dst, src, p):
    """Pure-JAX mirror of the PyTorch module (with max-subtracted pyg_softmax)."""
    H, d = ATTN_HEADS, ATTN_DIM

    def single(xg, eg, dg, sg):
        N = xg.shape[0]
        Qh = xg @ p["Wq"]
        Kh = xg @ p["Wk"]
        Vh = xg @ p["Wv"] + p["bv"]
        Eh = eg @ p["We"] + p["be"]
        Qdst, Ksrc, Vsrc = Qh[dg], Kh[sg], Vh[sg]
        msg1 = Qdst * Ksrc
        conn = jnp.maximum(
            jnp.sqrt(jnp.maximum(msg1, 0.0)) - jnp.sqrt(jnp.maximum(-msg1, 0.0)) + Eh, 0.0)
        Eo = conn
        connr = conn.reshape(-1, H, d)
        score = jnp.einsum("ehd,dhc->ehc", connr, p["Aw"])[..., 0]
        score = jnp.clip(score, -CLAMP, CLAMP)
        smax = jnp.full((N, H), -1e30, jnp.float32).at[dg].max(score)
        es = jnp.exp(score - smax[dg])
        den = jnp.zeros((N, H), jnp.float32).at[dg].add(es)
        w = es / (den[dg] + 1e-16)
        Vr = Vsrc.reshape(-1, H, d)
        agg = jnp.zeros((N, H, d), jnp.float32).at[dg].add(Vr * w[:, :, None])
        rowV = jnp.zeros((N, H, d), jnp.float32).at[dg].add(connr * w[:, :, None])
        rowV = jnp.einsum("nhd,dhc->nhc", rowV, p["BW"])
        return (agg + rowV).reshape(N, H * d), Eo

    return jax.vmap(single)(x, econn, dst, src)


if __name__ == "__main__":
    key = jax.random.PRNGKey(0)
    ks = jax.random.split(key, 12)

    def xavier(k, shape, fan_in, fan_out):
        std = (2.0 / (fan_in + fan_out)) ** 0.5
        return std * jax.random.normal(k, shape, dtype=jnp.float32)

    params = dict(
        # Linear weights stored already transposed: y = x @ W  (W: [in, out])
        Wq=xavier(ks[0], (HIDDEN_DIM, OUT_DIM), HIDDEN_DIM, OUT_DIM),
        Wk=xavier(ks[1], (HIDDEN_DIM, OUT_DIM), HIDDEN_DIM, OUT_DIM),
        Wv=xavier(ks[2], (HIDDEN_DIM, OUT_DIM), HIDDEN_DIM, OUT_DIM),
        bv=0.01 * jax.random.normal(ks[3], (OUT_DIM,), dtype=jnp.float32),
        We=xavier(ks[4], (HIDDEN_DIM, OUT_DIM), HIDDEN_DIM, OUT_DIM),
        be=0.01 * jax.random.normal(ks[5], (OUT_DIM,), dtype=jnp.float32),
        Aw=xavier(ks[6], (ATTN_DIM, ATTN_HEADS, 1), ATTN_HEADS, ATTN_DIM),
        BW=xavier(ks[7], (ATTN_DIM, ATTN_HEADS, ATTN_DIM),
                  ATTN_HEADS * ATTN_DIM, ATTN_DIM * ATTN_DIM),
    )

    G, N, E = N_GRAPHS, N_NODES, N_EDGES
    x = jax.random.normal(ks[8], (G, N, HIDDEN_DIM), dtype=jnp.float32)       # batch.x
    econn = jax.random.normal(ks[9], (G, E, HIDDEN_DIM), dtype=jnp.float32)   # batch.poly_conn
    dst = jax.random.randint(ks[10], (G, E), 0, N, dtype=jnp.int32)           # batch.poly_index[0]
    src = jax.random.randint(ks[11], (G, E), 0, N, dtype=jnp.int32)           # batch.poly_index[1]

    h_out, e_out = jax.block_until_ready(
        message_passing_forward(x, econn, dst, src, params))

    h_ref, e_ref = _reference_forward(x, econn, dst, src, params)
    assert jnp.allclose(h_out, h_ref, rtol=2e-3, atol=2e-3), "h_out mismatch"
    assert jnp.allclose(e_out, e_ref, rtol=2e-3, atol=2e-3), "e_out mismatch"

    print("KERNEL_OK")
</pallas_src>

<mosaic_0001>
module attributes {stable_mosaic.version = 11 : i64} {
  func.func @_mp_kernel(%arg0: i32, %arg1: memref<1x16x32xf32, #tpu.memory_space<vmem>>, %arg2: memref<1x32x32xf32, #tpu.memory_space<vmem>>, %arg3: memref<1x32x2xi32, #tpu.memory_space<vmem>>, %arg4: memref<1x1x32xi32, #tpu.memory_space<vmem>>, %arg5: memref<144x96xf32, #tpu.memory_space<vmem>>, %arg6: memref<1x16x32xf32, #tpu.memory_space<vmem>>, %arg7: memref<1x32x32xf32, #tpu.memory_space<vmem>>) attributes {dimension_semantics = [#tpu.dimension_semantics<parallel>], iteration_bounds = array<i64: 2>, scalar_prefetch = 0 : i64, scratch_operands = 0 : i64, tpu.core_type = #tpu.core_type<tc>, window_params = [{transform_indices = @transform_0, window_bounds = array<i64: 1, 16, 32>}, {transform_indices = @transform_1, window_bounds = array<i64: 1, 32, 32>}, {transform_indices = @transform_2, window_bounds = array<i64: 1, 32, 2>}, {transform_indices = @transform_3, window_bounds = array<i64: 1, 1, 32>}, {pipeline_mode = #tpu.pipeline_mode<synchronous>, transform_indices = @transform_4, window_bounds = array<i64: 144, 96>}, {transform_indices = @transform_5, window_bounds = array<i64: 1, 16, 32>}, {transform_indices = @transform_6, window_bounds = array<i64: 1, 32, 32>}]} {
    %c0 = arith.constant 0 : index
    %c0_0 = arith.constant 0 : index
    %c0_1 = arith.constant 0 : index
    %0 = vector.load %arg1[%c0, %c0_0, %c0_1] : memref<1x16x32xf32, #tpu.memory_space<vmem>>, vector<1x16x32xf32>
    %1 = vector.shape_cast %0 : vector<1x16x32xf32> to vector<16x32xf32>
    %c0_2 = arith.constant 0 : index
    %c0_3 = arith.constant 0 : index
    %c0_4 = arith.constant 0 : index
    %2 = vector.load %arg2[%c0_2, %c0_3, %c0_4] : memref<1x32x32xf32, #tpu.memory_space<vmem>>, vector<1x32x32xf32>
    %3 = vector.shape_cast %2 : vector<1x32x32xf32> to vector<32x32xf32>
    %c0_5 = arith.constant 0 : index
    %c0_6 = arith.constant 0 : index
    %c0_7 = arith.constant 0 : index
    %4 = vector.load %arg3[%c0_5, %c0_6, %c0_7] : memref<1x32x2xi32, #tpu.memory_space<vmem>>, vector<1x32x2xi32>
    %5 = vector.shape_cast %4 : vector<1x32x2xi32> to vector<32x2xi32>
    %c0_8 = arith.constant 0 : index
    %c0_9 = arith.constant 0 : index
    %c0_10 = arith.constant 0 : index
    %6 = vector.load %arg4[%c0_8, %c0_9, %c0_10] : memref<1x1x32xi32, #tpu.memory_space<vmem>>, vector<1x1x32xi32>
    %7 = vector.shape_cast %6 : vector<1x1x32xi32> to vector<1x32xi32>
    %c0_11 = arith.constant 0 : index
    %c0_12 = arith.constant 0 : index
    %8 = vector.load %arg5[%c0_11, %c0_12] : memref<144x96xf32, #tpu.memory_space<vmem>>, vector<32x96xf32>
    %c32 = arith.constant 32 : index
    %c0_13 = arith.constant 0 : index
    %9 = vector.load %arg5[%c32, %c0_13] : memref<144x96xf32, #tpu.memory_space<vmem>>, vector<1x96xf32>
    %c40 = arith.constant 40 : index
    %c0_14 = arith.constant 0 : index
    %10 = vector.load %arg5[%c40, %c0_14] : memref<144x96xf32, #tpu.memory_space<vmem>>, vector<32x32xf32>
    %c72 = arith.constant 72 : index
    %c0_15 = arith.constant 0 : index
    %11 = vector.load %arg5[%c72, %c0_15] : memref<144x96xf32, #tpu.memory_space<vmem>>, vector<1x32xf32>
    %c80 = arith.constant 80 : index
    %c0_16 = arith.constant 0 : index
    %12 = vector.load %arg5[%c80, %c0_16] : memref<144x96xf32, #tpu.memory_space<vmem>>, vector<32x32xf32>
    %c112 = arith.constant 112 : index
    %c0_17 = arith.constant 0 : index
    %13 = vector.load %arg5[%c112, %c0_17] : memref<144x96xf32, #tpu.memory_space<vmem>>, vector<32x32xf32>
    %14 = tpu.iota {dimensions = array<i32: 1>} : vector<32x16xi32>
    %15 = vector.extract_strided_slice %5 {offsets = [0, 0], sizes = [32, 1], strides = [1, 1]} : vector<32x2xi32> to vector<32x1xi32>
    %16 = vector.broadcast %15 : vector<32x1xi32> to vector<32x16xi32>
    %17 = arith.cmpi eq, %16, %14 : vector<32x16xi32>
    %18 = arith.extui %17 : vector<32x16xi1> to vector<32x16xi32>
    %19 = arith.sitofp %18 : vector<32x16xi32> to vector<32x16xf32>
    %20 = vector.extract_strided_slice %5 {offsets = [0, 1], sizes = [32, 1], strides = [1, 1]} : vector<32x2xi32> to vector<32x1xi32>
    %21 = vector.broadcast %20 : vector<32x1xi32> to vector<32x16xi32>
    %22 = arith.cmpi eq, %21, %14 : vector<32x16xi32>
    %23 = arith.extui %22 : vector<32x16xi1> to vector<32x16xi32>
    %24 = arith.sitofp %23 : vector<32x16xi32> to vector<32x16xf32>
    %25 = tpu.iota {dimensions = array<i32: 0>} : vector<16x32xi32>
    %26 = vector.broadcast %7 : vector<1x32xi32> to vector<16x32xi32>
    %27 = arith.cmpi eq, %25, %26 : vector<16x32xi32>
    %28 = arith.extui %27 : vector<16x32xi1> to vector<16x32xi32>
    %29 = arith.sitofp %28 : vector<16x32xi32> to vector<16x32xf32>
    %cst = arith.constant dense<0.000000e+00> : vector<16x96xf32>
    %30 = tpu.matmul %1, %8, %cst {dimension_numbers = #tpu.dot_dimension_numbers<[1], [0], [0], [1], [0, 0, 1, 1], [], []>} : vector<16x32xf32>, vector<32x96xf32>, vector<16x96xf32> -> vector<16x96xf32>
    %31 = vector.broadcast %9 : vector<1x96xf32> to vector<16x96xf32>
    %32 = arith.addf %30, %31 : vector<16x96xf32>
    %cst_18 = arith.constant dense<0.000000e+00> : vector<32x32xf32>
    %33 = tpu.matmul %3, %10, %cst_18 {dimension_numbers = #tpu.dot_dimension_numbers<[1], [0], [0], [1], [0, 0, 1, 1], [], []>} : vector<32x32xf32>, vector<32x32xf32>, vector<32x32xf32> -> vector<32x32xf32>
    %34 = vector.broadcast %11 : vector<1x32xf32> to vector<32x32xf32>
    %35 = arith.addf %33, %34 : vector<32x32xf32>
    %36 = vector.extract_strided_slice %32 {offsets = [0, 0], sizes = [16, 32], strides = [1, 1]} : vector<16x96xf32> to vector<16x32xf32>
    %cst_19 = arith.constant dense<0.000000e+00> : vector<32x32xf32>
    %37 = tpu.matmul %19, %36, %cst_19 {dimension_numbers = #tpu.dot_dimension_numbers<[1], [0], [0], [1], [0, 0, 1, 1], [], []>} : vector<32x16xf32>, vector<16x32xf32>, vector<32x32xf32> -> vector<32x32xf32>
    %38 = vector.extract_strided_slice %32 {offsets = [0, 32], sizes = [16, 64], strides = [1, 1]} : vector<16x96xf32> to vector<16x64xf32>
    %cst_20 = arith.constant dense<0.000000e+00> : vector<32x64xf32>
    %39 = tpu.matmul %24, %38, %cst_20 {dimension_numbers = #tpu.dot_dimension_numbers<[1], [0], [0], [1], [0, 0, 1, 1], [], []>} : vector<32x16xf32>, vector<16x64xf32>, vector<32x64xf32> -> vector<32x64xf32>
    %40 = vector.extract_strided_slice %39 {offsets = [0, 0], sizes = [32, 32], strides = [1, 1]} : vector<32x64xf32> to vector<32x32xf32>
    %41 = vector.extract_strided_slice %39 {offsets = [0, 32], sizes = [32, 32], strides = [1, 1]} : vector<32x64xf32> to vector<32x32xf32>
    %42 = arith.mulf %37, %40 : vector<32x32xf32>
    %cst_21 = arith.constant 0.000000e+00 : f32
    %43 = vector.broadcast %cst_21 : f32 to vector<32x32xf32>
    %44 = arith.maximumf %42, %43 : vector<32x32xf32>
    %45 = math.sqrt %44 : vector<32x32xf32>
    %cst_22 = arith.constant 0.000000e+00 : f32
    %46 = vector.broadcast %cst_22 : f32 to vector<32x32xf32>
    %47 = arith.subf %46, %42 : vector<32x32xf32>
    %cst_23 = arith.constant 0.000000e+00 : f32
    %48 = vector.broadcast %cst_23 : f32 to vector<32x32xf32>
    %49 = arith.maximumf %47, %48 : vector<32x32xf32>
    %50 = math.sqrt %49 : vector<32x32xf32>
    %51 = arith.subf %45, %50 : vector<32x32xf32>
    %52 = arith.addf %51, %35 : vector<32x32xf32>
    %cst_24 = arith.constant 0.000000e+00 : f32
    %53 = vector.broadcast %cst_24 : f32 to vector<32x32xf32>
    %54 = arith.maximumf %52, %53 : vector<32x32xf32>
    %c0_25 = arith.constant 0 : index
    %c0_26 = arith.constant 0 : index
    %c0_27 = arith.constant 0 : index
    %55 = vector.load %arg7[%c0_25, %c0_26, %c0_27] : memref<1x32x32xf32, #tpu.memory_space<vmem>>, vector<1x32x32xf32>
    %56 = vector.shape_cast %55 : vector<1x32x32xf32> to vector<32x32xf32>
    %57 = vector.shape_cast %54 : vector<32x32xf32> to vector<1x32x32xf32>
    tpu.vector_store %arg7[%c0_25, %c0_26, %c0_27], %57 {strides = array<i32>} : memref<1x32x32xf32, #tpu.memory_space<vmem>>, vector<1x32x32xf32>,
    %cst_28 = arith.constant dense<0.000000e+00> : vector<32x32xf32>
    %58 = tpu.matmul %54, %12, %cst_28 {dimension_numbers = #tpu.dot_dimension_numbers<[1], [0], [0], [1], [0, 0, 1, 1], [], []>} : vector<32x32xf32>, vector<32x32xf32>, vector<32x32xf32> -> vector<32x32xf32>
    %cst_29 = arith.constant -5.000000e+00 : f32
    %cst_30 = arith.constant 5.000000e+00 : f32
    %59 = vector.broadcast %cst_29 : f32 to vector<32x32xf32>
    %60 = arith.maximumf %59, %58 : vector<32x32xf32>
    %61 = vector.broadcast %cst_30 : f32 to vector<32x32xf32>
    %62 = arith.minimumf %61, %60 : vector<32x32xf32>
    %63 = math.exp %62 : vector<32x32xf32>
    %64 = arith.mulf %41, %63 : vector<32x32xf32>
    %65 = arith.mulf %54, %63 : vector<32x32xf32>
    %66 = tpu.concatenate %63, %64, %65 in 1 : vector<32x32xf32>, vector<32x32xf32>, vector<32x32xf32> -> vector<32x96xf32>
    %cst_31 = arith.constant dense<0.000000e+00> : vector<16x96xf32>
    %67 = tpu.matmul %29, %66, %cst_31 {dimension_numbers = #tpu.dot_dimension_numbers<[1], [0], [0], [1], [0, 0, 1, 1], [], []>} : vector<16x32xf32>, vector<32x96xf32>, vector<16x96xf32> -> vector<16x96xf32>
    %68 = vector.extract_strided_slice %67 {offsets = [0, 0], sizes = [16, 32], strides = [1, 1]} : vector<16x96xf32> to vector<16x32xf32>
    %cst_32 = arith.constant 1.000000e-16 : f32
    %69 = vector.broadcast %cst_32 : f32 to vector<16x32xf32>
    %70 = arith.addf %68, %69 : vector<16x32xf32>
    %71 = tpu.reciprocal %70 : vector<16x32xf32> -> vector<16x32xf32>
    %72 = vector.extract_strided_slice %67 {offsets = [0, 32], sizes = [16, 32], strides = [1, 1]} : vector<16x96xf32> to vector<16x32xf32>
    %73 = arith.mulf %71, %72 : vector<16x32xf32>
    %74 = vector.extract_strided_slice %67 {offsets = [0, 64], sizes = [16, 32], strides = [1, 1]} : vector<16x96xf32> to vector<16x32xf32>
    %75 = arith.mulf %71, %74 : vector<16x32xf32>
    %cst_33 = arith.constant dense<0.000000e+00> : vector<16x32xf32>
    %76 = tpu.matmul %75, %13, %cst_33 {dimension_numbers = #tpu.dot_dimension_numbers<[1], [0], [0], [1], [0, 0, 1, 1], [], []>} : vector<16x32xf32>, vector<32x32xf32>, vector<16x32xf32> -> vector<16x32xf32>
    %77 = arith.addf %73, %76 : vector<16x32xf32>
    %c0_34 = arith.constant 0 : index
    %c0_35 = arith.constant 0 : index
    %c0_36 = arith.constant 0 : index
    %78 = vector.load %arg6[%c0_34, %c0_35, %c0_36] : memref<1x16x32xf32, #tpu.memory_space<vmem>>, vector<1x16x32xf32>
    %79 = vector.shape_cast %78 : vector<1x16x32xf32> to vector<16x32xf32>
    %80 = vector.shape_cast %77 : vector<16x32xf32> to vector<1x16x32xf32>
    tpu.vector_store %arg6[%c0_34, %c0_35, %c0_36], %80 {strides = array<i32>} : memref<1x16x32xf32, #tpu.memory_space<vmem>>, vector<1x16x32xf32>,
    return
  }
  func.func @transform_0(%arg0: i32) -> (i32, i32, i32) {
    %c0_i32 = arith.constant 0 : i32
    %c0_i32_0 = arith.constant 0 : i32
    %c0_i32_1 = arith.constant 0 : i32
    return %arg0, %c0_i32, %c0_i32_0 : i32, i32, i32
  }
  func.func @transform_1(%arg0: i32) -> (i32, i32, i32) {
    %c0_i32 = arith.constant 0 : i32
    %c0_i32_0 = arith.constant 0 : i32
    %c0_i32_1 = arith.constant 0 : i32
    return %arg0, %c0_i32, %c0_i32_0 : i32, i32, i32
  }
  func.func @transform_2(%arg0: i32) -> (i32, i32, i32) {
    %c0_i32 = arith.constant 0 : i32
    %c0_i32_0 = arith.constant 0 : i32
    %c0_i32_1 = arith.constant 0 : i32
    return %arg0, %c0_i32, %c0_i32_0 : i32, i32, i32
  }
  func.func @transform_3(%arg0: i32) -> (i32, i32, i32) {
    %c0_i32 = arith.constant 0 : i32
    %c0_i32_0 = arith.constant 0 : i32
    %c0_i32_1 = arith.constant 0 : i32
    return %arg0, %c0_i32, %c0_i32_0 : i32, i32, i32
  }
  func.func @transform_4(%arg0: i32) -> (i32, i32) {
    %c0_i32 = arith.constant 0 : i32
    %c0_i32_0 = arith.constant 0 : i32
    %c0_i32_1 = arith.constant 0 : i32
    return %c0_i32, %c0_i32_0 : i32, i32
  }
  func.func @transform_5(%arg0: i32) -> (i32, i32, i32) {
    %c0_i32 = arith.constant 0 : i32
    %c0_i32_0 = arith.constant 0 : i32
    %c0_i32_1 = arith.constant 0 : i32
    return %arg0, %c0_i32, %c0_i32_0 : i32, i32, i32
  }
  func.func @transform_6(%arg0: i32) -> (i32, i32, i32) {
    %c0_i32 = arith.constant 0 : i32
    %c0_i32_0 = arith.constant 0 : i32
    %c0_i32_1 = arith.constant 0 : i32
    return %arg0, %c0_i32, %c0_i32_0 : i32, i32, i32
  }
}

</mosaic_0001>

<bundles_post_ra>
// kernel: tpu_custom_call.1
= control target key start
LH: loop header
LB: loop body
LE: loop exit
PB: predicated region body
PF: predicated region fallthrough
CT: control target
= control target key end

     0   :  { %12 = vsyncpa [#allocation3], 0  ;;  %s2437_s0 = inlined_call_operand.hbm [shape: f32[2,16,32], index: 0, kind: input, shape index: {}]   ;;  %s2438_s1 = inlined_call_operand.vmem [shape: f32[2,32,32], index: 1, kind: input, shape index: {}]   ;;  %s2439_s2 = inlined_call_operand.vmem [shape: s32[2,32,2], index: 2, kind: input, shape index: {}]   ;;  %s2440_s3 = inlined_call_operand.vmem [shape: s32[2,1,32], index: 3, kind: input, shape index: {}]   ;;  %s2441_s4 = inlined_call_operand.hbm [shape: f32[144,96], index: 4, kind: input, shape index: {}]   ;;  %s2442_s5 = inlined_call_operand.hbm [shape: f32[2,16,32], index: 5, kind: output, shape index: {0}]   ;;  %s2443_s6 = inlined_call_operand.hbm [shape: f32[2,32,32], index: 6, kind: output, shape index: {1}]  }
   0x1   :  { %14 = vsyncpa [#allocation3 + $0x1], 0 }
   0x2   :  { %15 = vsyncpa [#allocation6], 0 }
   0x3   :  { %16 = vsyncpa [#allocation4], 0 }
   0x4   :  { %18 = vsyncpa [#allocation4 + $0x1], 0 }
   0x5   :  { %19 = vsyncpa [#allocation9], 0 }
   0x6   :  { %21 = vsyncpa [#allocation9 + $0x1], 0  ;;  %s2030_s21 = smov 0   ;;  %s2032_s22 = smov 0  }
   0x7   :  { %s2034_s23 = smov 0   ;;  %s2036_s24 = smov 0  }
   0x8 LB: > { %s2051_s25 = sadd.s32 4294967295, %s1979_s24   ;;  %s1453_s26 = sadd.s32 4294967294, %s1979_s24   ;;  %s1979_s24 = sphi %s2036_s24, %s2463_s24   ;;  %s1975_s23 = sphi %s2034_s23, %s2462_s23   ;;  %s1971_s22 = sphi %s2032_s22, %s2461_s22   ;;  %s1967_s21 = sphi %s2030_s21, %s2460_s21  }
   0x9   : > { %p47_p0 = scmp.ne.s32.totalorder %s1971_s22, %s1967_s21  ;;  %p2444_p1 = scmp.eq.s32.totalorder %s2051_s25, 0 }
   0xa   : > { %p176_p3 = scmp.eq.s32.totalorder %s1453_s26, 1  ;;  %p1454_p5 = scmp.ge.s32.totalorder %s1979_s24, 1 }
   0xb   : > { %p2060_p4 = por %p2444_p1, %p47_p0  ;;  %p209_p7 = scmp.lt.s32.totalorder %s1979_s24, 3 }
   0xc   : > { %p2065_p6 = por %p176_p3, %p47_p0  ;;  %s1981_s30 = smov [#allocation5]  }
   0xd   : > { %s2447_s27 = scalar_select %p2060_p4, 1, 0 }
   0xe   : > { %s2448_s28 = scalar_select %p2065_p6, 1, 0 }
   0xf   : > { %p2070_p8 = pnand %p1454_p5, %p209_p7  ;;  %s221_s7 = sshll.u32 %s1981_s30, 4  ;;  %s2074_s7 = int_to_ptr.vmem [resolvable:$true] %s221_s7 }
  0x10   : > { %s2086_s9 = sadd.s32 1, %s1979_s24   ;;  %s34_s10 = sadd.s32 1, %s1975_s23 }
  0x11   : > { %s2449_s29 = scalar_select %p2070_p8, 1, 0 }
  0x12   : > { %p1706_p9 = pneg %p2070_p8  ;;  %s31_s11 = ssub.s32 %s1979_s24, %s2086_s9 }
  0x13   : > { %s1819_s14 = scalar_lea.hbm %s2441_s4, 2304 }
  0x14   : > { %p2081_p11 = pnand %p1706_p9, %p2444_p1  ;;  %p1820_p12 = scmp.ne.s32.totalorder %s2441_s4, %s1819_s14 }
  0x15   : > { %p1826_p5 = scmp.lt.u32.totalorder %s1819_s14, %s2441_s4 }
  0x16   : > { %p1821_p13 = pneg %p2081_p11 }
  0x18   : > { %p1822_p0 = pnand %p1821_p13, %p1820_p12 }
  0x1a   : > { %p1823_p3 = pneg %p1822_p0 }
  0x1c   : > { %p1828_p7 = pnand %p1826_p5, %p1823_p3 }
  0x1e   : > { %1831 = shalt.err (!%p1828_p7)
}
  0x1f   : > { %s1832_s19 = scalar_lea.vmem %s2074_s7, 2304  ;;  %p1840_p2 = scmp.lt.s32.totalorder %s2074_s7, %s2074_s7 }
  0x20   : > { %p1833_p9 = scmp.ne.s32.totalorder %s2074_s7, %s1832_s19  ;;  %p1841_p6 = scmp.lt.s32.totalorder %s1832_s19, %s1832_s19 }
  0x22   : > { %p1835_p10 = pnand %p1833_p9, %p1821_p13  ;;  %p1842_p4 = por %p1841_p6, %p1840_p2 }
  0x24   : > { %p1836_p1 = pneg %p1835_p10 }
  0x26   : > { %p1843_p8 = pnand %p1842_p4, %p1836_p1 }
  0x28   : > { %1846 = shalt.err (!%p1843_p8)
}
  0x29   : > { %s1982_s20 = smov 128   ;;  %s1983_s26 = smov 8  }
  0x2a   : > { %1709 = dma.hbm_to_vmem [thread:$0]  (!%p2081_p11), %s2441_s4, 2304, %s2074_s7, [#allocation6], %s1982_s20, %s1982_s20, %s1983_s26  }
  0x2b   : > { %p32_p1 = scmp.eq.s32.totalorder %s31_s11, 0  ;;  %p41_p2 = scmp.ne.s32.totalorder %s1975_s23, %s1971_s22 }
  0x2c   : > { %p42_p4 = scmp.eq.s32.totalorder %s1979_s24, 0  ;;  %p1722_p6 = scmp.lt.s32.totalorder %s1979_s24, 2 }
  0x2d   : > { %s2120_s13 = scalar_select %p32_p1, %s1975_s23, %s34_s10  }
  0x2e   : > { %p43_p8 = por %p42_p4, %p41_p2  ;;  %p2451_p10 = scmp.eq.s32.totalorder %s2051_s25, 1 }
  0x2f   : > { %s235_s8 = sand.u32 1, %s1975_s23   ;;  %s1516_s15 = sshll.u32 %s1979_s24, 8 }
  0x30   : > { %p2124_p12 = por %p2451_p10, %p41_p2  ;;  %s1457_s16 = sshll.u32 %s235_s8, 4 }
  0x31   : > { %s2133_s19 = scalar_lea.hbm %s2437_s0, %s1516_s15  ;;  %s239_s7 = scalar_lea.vmem [#allocation2], %s1457_s16 }
  0x32   : > { %s246_s10 = sshll.u32 %s239_s7, 4  ;;  %p2135_p11 = pnand %p1722_p6, %p43_p8  ;;  %s2139_s10 = int_to_ptr.vmem [resolvable:$true] %s246_s10 }
  0x33   : > { %s2141_s30 = scalar_lea.sflag [#allocation3], %s235_s8  ;;  %s1847_s12 = scalar_lea.hbm %s2133_s19, 256 }
  0x34   : > { %p1848_p13 = scmp.ne.s32.totalorder %s2133_s19, %s1847_s12  ;;  %p1849_p0 = pneg %p2135_p11 }
  0x35   : > { %s1852_s17 = scalar_lea.hbm %s2437_s0, 512  ;;  %p1853_p7 = scmp.lt.u32.totalorder %s2133_s19, %s2437_s0 }
  0x36   : > { %p1850_p3 = pnand %p1849_p0, %p1848_p13  ;;  %p1854_p9 = scmp.lt.u32.totalorder %s1852_s17, %s1847_s12 }
  0x37   : > { %p1856_p2 = scmp.lt.u32.totalorder %s1847_s12, %s2133_s19 }
  0x38   : > { %p1851_p5 = pneg %p1850_p3  ;;  %p1855_p1 = por %p1854_p9, %p1853_p7 }
  0x3a   : > { %p1857_p4 = por %p1856_p2, %p1855_p1 }
  0x3c   : > { %p1858_p6 = pnand %p1857_p4, %p1851_p5 }
  0x3e   : > { %1861 = shalt.err (!%p1858_p6)
}
  0x3f   : > { %s1862_s8 = scalar_lea.vmem %s2139_s10, 256  ;;  %s1984_s15 = smov [#allocation2]  }
  0x40   : > { %p1863_p8 = scmp.ne.s32.totalorder %s2139_s10, %s1862_s8  ;;  %s1867_s16 = sshll.u32 %s1984_s15, 4  ;;  %s1868_s16 = int_to_ptr.vmem [resolvable:$false] %s1867_s16 }
  0x41   : > { %s1869_s18 = scalar_lea.vmem %s1868_s16, 512  ;;  %p1870_p3 = scmp.lt.s32.totalorder %s2139_s10, %s1868_s16 }
  0x42   : > { %p1865_p10 = pnand %p1863_p8, %p1849_p0  ;;  %p1871_p7 = scmp.lt.s32.totalorder %s1869_s18, %s1862_s8 }
  0x44   : > { %p1866_p13 = pneg %p1865_p10  ;;  %p1872_p9 = por %p1871_p7, %p1870_p3 }
  0x46   : > { %p1873_p1 = pnand %p1872_p9, %p1866_p13 }
  0x48   : > { %1876 = shalt.err (!%p1873_p1)
}
  0x49   : > { %1713 = dma.hbm_to_vmem [thread:$0]  (!%p2135_p11), %s2133_s19, 256, %s2139_s10, %s2141_s30, %s1982_s20, %s1982_s20, %s1983_s26  }
  0x4a   : > { %p2454_p0 = scmp.ne.s32.totalorder %s2449_s29, 0 }
  0x4b   : > { %s2175_s12 = sand.u32 (!%p2454_p0), 1, %s1971_s22   ;;  %p2455_p5 = scmp.ne.s32.totalorder (!%p2454_p0), %s2447_s27, 0 }
  0x4c   : > { %280 = sbr.rel (%p2454_p0) target bundleno = 1608 (0x648), region = 40  ;;  %s1461_s17 = sshll.u32 (!%p2454_p0), %s2175_s12, 4 }
  0x4d   : > { %s283_s7 = scalar_lea.sflag (!%p2454_p0), [#allocation3], %s2175_s12  ;;  %s2181_s11 = scalar_lea.vmem (!%p2454_p0), [#allocation2], %s1461_s17 }
  0x53   : > { %1950 = dma.done.wait (%p2455_p5), %s283_s7, 256  }
  0x54   : > { %1952 = vsyncadd (%p2455_p5), %s283_s7, 4294967040  ;;  %p2456_p11 = scmp.eq.s32.totalorder %s2051_s25, 0 }
  0x56   : > { %1954 = dma.done.wait (%p2456_p11), [#allocation6], 2304   ;;  %p2457_p2 = pmov %p2456_p11 }
  0x57   : > { %p337_p4 = scmp.lt.s32.totalorder %s2051_s25, 1  ;;  %v1985_v0 = vmov 0   ;;  %vm446_vm0 = vcmask 261120   ;;  %v361_v1 = vld [vmem:[#allocation5] sm:$0xff]  ;;  %v362_v2 = vld [vmem:[#allocation5 + $0x8] sm:$0xff]  ;;  %v363_v3 = vld [vmem:[#allocation5 + $0x10] sm:$0xff]  ;;  %v379_v21 = vlaneseq }
  0x58   : > { %1956 = vsyncadd (%p2457_p2), [#allocation6], 4294964992  ;;  %1770 = vset.pattern.permute.xlu1 %v1985_v0  ;;  %1768 = vset.pattern.permute.xlu0 %v1985_v0  ;;  %v1648_v4 = vpack.c.bf16 %v362_v2, %v361_v1  ;;  %v364_v5 = vld [vmem:[#allocation5 + $0x18] sm:$0xff]  ;;  %v350_v6 = vld [vmem:[%s2181_s11] sm:$0xff]  ;;  %v1986_v10 = vmov 1   ;;  %vm629_vm1 = vcmask 130048  }
  0x59   : > { %s2193_s29 = scalar_select %p337_p4, %s2051_s25, 1  ;;  %v1652_v7 = vpack.c.bf16 %v364_v5, %v363_v3  ;;  %1575 = vmatprep.mubr.msk.f32.mxu0 %vm446_vm0, %v350_v6  ;;  %v351_v11 = vld [vmem:[%s2181_s11 + $0x8] sm:$0xff]  ;;  %v367_v15 = vld [vmem:[#allocation5 + $0x30] sm:$0xff]  ;;  %v369_v18 = vld [vmem:[#allocation5 + $0x40] sm:$0xff]  ;;  %v380_v22 = vand.u32 127, %v379_v21  ;;  %v1987_v24 = vmov 0.0  }
  0x5a   : > { %1649 = vmatprep.subr.bf16.mxu0 %v1648_v4  ;;  %v366_v14 = vld [vmem:[#allocation5 + $0x28] sm:$0xff]  ;;  %v368_v16 = vld [vmem:[#allocation5 + $0x38] sm:$0xff]  ;;  %v1480_v32 = vld [vmem:[#allocation5 + $0x20] ss:$0 sm:$0xff]  ;;  %s1988_s15 = smov 96   ;;  %s1464_s16 = sshll.u32 %s2175_s12, 5 }
  0x5b   : > { %s1517_s20 = sshll.u32 %s2193_s29, 5  ;;  %1651 = vmatpush3.bf16.msra.mxu0 %v1648_v4  ;;  %v1656_v17 = vpack.c.bf16 %v367_v15, %v366_v14  ;;  %v1660_v20 = vpack.c.bf16 %v369_v18, %v368_v16  ;;  %v371_v62 = vld [vmem:[#allocation5 + $0x50] sm:$0xff]  ;;  %v372_v63 = vld [vmem:[#allocation5 + $0x58] sm:$0xff]  ;;  %v373_v1 = vld [vmem:[#allocation5 + $0x60] sm:$0xff]  ;;  %s2277_s18 = scalar_lea.vmem [#allocation8], %s1464_s16 }
  0x5c   : > { %s346_s19 = scalar_lea.vmem %s2439_s2, %s1517_s20  ;;  %1653 = vmatprep.subr.bf16.mxu0 %v1652_v7  ;;  %s341_s8 = scalar_lea.vmem %s2438_s1, %s1517_s20  ;;  %v374_v2 = vld [vmem:[#allocation5 + $0x68] sm:$0xff] }
  0x5d   : > { %v357_v8 = vld [vmem:[%s346_s19 + $0x8] sm:$0xff]  ;;  %v356_v9 = vld [vmem:[%s346_s19] sm:$0xff]  ;;  %v358_v12 = vld [vmem:[%s346_s19 + $0x10] sm:$0xff]  ;;  %1657 = vmatprep.subr.bf16.mxu1 %v1656_v17  ;;  %v1676_v3 = vpack.c.bf16 %v374_v2, %v373_v1  ;;  %s1989_s7 = smov 32   ;;  %s1990_s11 = smov 64  }
  0x5e   : > { %385 = vperm.xlu1 %1770, %v357_v8   ;;  %382 = vperm.xlu0 %1768, %v356_v9   ;;  %v359_v13 = vld [vmem:[%s346_s19 + $0x18] sm:$0xff]  ;;  %v352_v19 = vld [vmem:[%s341_s8] sm:$0xff]  ;;  %v353_v27 = vld [vmem:[%s341_s8 + $0x8] sm:$0xff]  ;;  %s349_s26 = scalar_lea.vmem %s2440_s3, %s2193_s29  ;;  %s1520_s29 = sshll.u32 %s2051_s25, 9 }
  0x5f   : > { %1655 = vmatpush3.bf16.msra.mxu0 %v1652_v7  ;;  %1586 = vmatprep.mubr.msk.f32.mxu1 %vm446_vm0, %v352_v19  ;;  %v354_v29 = vld [vmem:[%s341_s8 + $0x10] sm:$0xff]  ;;  %v355_v30 = vld [vmem:[%s341_s8 + $0x18] sm:$0xff]  ;;  %s2348_s30 = scalar_lea.hbm %s2443_s6, %s1520_s29  ;;  %s1305_s8 = sshll.u32 %s2277_s18, 4  ;;  %s2351_s8 = int_to_ptr.vmem [resolvable:$true] %s1305_s8 }
  0x60   : > { %1659 = vmatpush3.bf16.msra.mxu1 %v1656_v17  ;;  %s1877_s16 = scalar_lea.vmem %s2351_s8, 512 }
  0x61   : > { %1661 = vmatprep.subr.bf16.mxu1 %v1660_v20  ;;  %p1878_p6 = scmp.ne.s32.totalorder %s2351_s8, %s1877_s16 }
  0x62   : > { %1771 = vset.pattern.permute.xlu1 %v1986_v10  ;;  %1769 = vset.pattern.permute.xlu0 %v1986_v10 }
  0x63   : > { %409 = vperm.xlu1 %1771, %v357_v8   ;;  %406 = vperm.xlu0 %1769, %v356_v9   ;;  %p1879_p8 = pnand %p1878_p6, %p2124_p12 }
  0x64   : > { %1576 = vmatmul.mubr.msk.f32.vlgmr.msra.gmra.mrb[0].mxu0 %vm446_vm0, %v351_v11  ;;  %1663 = vmatpush3.bf16.msra.mxu1 %v1660_v20 }
  0x65   : > { %p1880_p10 = pneg %p1879_p8 }
  0x67   : > { %1772 = vset.pattern.permute.xlu1 %v1985_v0  ;;  %412 = vperm.xlu0 %1769, %v358_v12  }
  0x68   : > { %388 = vperm.xlu1 %1772, %v358_v12   ;;  %1587 = vmatmul.mubr.msk.f32.vlgmr.msra.gmra.mrb[0].mxu1 %vm446_vm0, %v353_v27 }
  0x69   : > { %1589 = vmatprep.mubr.msk.f32.mxu1 %vm446_vm0, %v354_v29 }
  0x6b   : > { %1773 = vset.pattern.permute.xlu0 %v1985_v0  ;;  %v1672_v0 = vpack.c.bf16 %v372_v63, %v371_v62 }
  0x6c   : > { %1779 = vset.pattern.permute.xlu1 %v1986_v10  ;;  %391 = vperm.xlu0 %1773, %v359_v13  }
  0x6d   : > { %1590 = vmatmul.mubr.msk.f32.gmra.mrb[2].mxu1 %vm446_vm0, %v355_v30 }
  0x70   : > { %1790 = vset.pattern.permute.xlu0 %v1986_v10 }
  0xdd   : > { %v383_v23 = vpop.permute.xlu0 %382  ;;  %v386_v26 = vpop.permute.xlu1 %385 }
  0xde   : > { %vm393_vm2 = vcmp.eq.s32.totalorder %v383_v23, %v380_v22  ;;  %vm394_vm4 = vcmp.eq.s32.totalorder %v386_v26, %v380_v22 }
  0xdf   : > { %v1469_v25 = vsel %vm393_vm2, 1.0, %v1987_v24  ;;  %v1470_v42 = vsel %vm394_vm4, 1.0, %v1987_v24 }
  0xe0   : > { %1596 = vmatprep.mubr.msk.f32.mxu0 %vm629_vm1, %v1469_v25 }
  0xe2   : > { %v407_v28 = vpop.permute.xlu0 %406  ;;  %v410_v33 = vpop.permute.xlu1 %409 }
  0xe3   : > { %vm417_vm3 = vcmp.eq.s32.totalorder %v407_v28, %v380_v22  ;;  %vm418_vm8 = vcmp.eq.s32.totalorder %v410_v33, %v380_v22 }
  0xe4   : > { %v1473_v31 = vsel %vm417_vm3, 1.0, %v1987_v24  ;;  %v1474_v51 = vsel %vm418_vm8, 1.0, %v1987_v24 }
  0xe5   : > { %1606 = vmatprep.mubr.msk.f32.mxu1 %vm629_vm1, %v1473_v31 }
  0xe6   : > { %v413_v38 = vpop.permute.xlu0 %412 }
  0xe7   : > { %v389_v41 = vpop.permute.xlu1 %388  ;;  %vm419_vm7 = vcmp.eq.s32.totalorder %v413_v38, %v380_v22 }
  0xe8   : > { %vm395_vm5 = vcmp.eq.s32.totalorder %v389_v41, %v380_v22  ;;  %v1475_v50 = vsel %vm419_vm7, 1.0, %v1987_v24 }
  0xe9   : > { %v1471_v44 = vsel %vm395_vm5, 1.0, %v1987_v24 }
  0xeb   : > { %v392_v43 = vpop.permute.xlu0 %391 }
  0xec   : > { %vm396_vm6 = vcmp.eq.s32.totalorder %v392_v43, %v380_v22 }
  0xed   : > { %v1472_v45 = vsel %vm396_vm6, 1.0, %v1987_v24 }
 0x137   : > { %v1577_v34 = vpop.f32.mrb[0].mxu0 }
 0x138   : > { %v525_v35 = vadd.f32 %v1577_v34, %v1480_v32  ;;  %v519_v36 = vpop.f32.mrb[1].mxu0 }
 0x139   : > { %v520_v37 = vadd.f32 %v1480_v32, %v519_v36  ;;  %v1483_v36 = vld [vmem:[#allocation5 + $0x48] ss:$0 sm:$0xff] }
 0x13b   : > { %v1774_v39 = vpack.i.bf16 %v525_v35, %v520_v37  ;;  %v1664_v40 = vpack.c.bf16 %v525_v35, %v520_v37  ;;  %v2232_v54 = vpop.f32.mrb[0].mxu1 }
 0x13c   : > { %v2234_v55 = vpop.f32.mrb[1].mxu1 }
 0x13d   : > { %1775 = vrot.lane.b32.xlu1 %v1774_v39, %s1988_s15  ;;  %1665 = vmatprep.subr.bf16.mxu0 %v1664_v40 }
 0x13e   : > { %1667 = vmatpush3.bf16.msra.mxu0 %v1664_v40 }
 0x13f   : > { %1673 = vmatprep.subr.bf16.mxu0 %v1672_v0 }
 0x140   : > { %v2236_v56 = vpop.f32.mrb[2].mxu1 }
 0x141   : > { %415 = vperm.xlu1 %1779, %v359_v13   ;;  %1597 = vmatmul.mubr.msk.f32.vlgmr.msra.gmra.mrb[2].mxu0 %vm629_vm1, %v1470_v42  ;;  %v2238_v57 = vpop.f32.mrb[3].mxu1 }
 0x142   : > { %1599 = vmatprep.mubr.msk.f32.mxu0 %vm629_vm1, %v1471_v44  ;;  %1675 = vmatpush3.bf16.msra.mxu0 %v1672_v0 }
 0x143   : > { %1677 = vmatprep.subr.bf16.mxu0 %v1676_v3 }
 0x145   : > { %1600 = vmatmul.mubr.msk.f32.gmra.mrb[4].mxu0 %vm629_vm1, %v1472_v45  ;;  %v616_v45 = vadd.f32 %v2232_v54, %v1483_v36 }
 0x146   : > { %1679 = vmatpush3.bf16.msra.mxu0 %v1676_v3 }
 0x1af   : > { %v1776_v46 = vpop.permute.xlu1 %1775 }
 0x1b0   : > { %v1778_v47 = vunpack.i.h.bf16 %v1776_v46  ;;  %v1777_v48 = vunpack.i.l.bf16 %v1776_v46 }
 0x1b2   : > { %v1668_v49 = vpack.c.bf16 %v1778_v47, %v1777_v48 }
 0x1b4   : > { %1669 = vmatprep.subr.bf16.mxu1 %v1668_v49 }
 0x1b5   : > { %1671 = vmatpush3.bf16.msra.mxu1 %v1668_v49  ;;  %v611_v49 = vadd.f32 %v1483_v36, %v2234_v55 }
 0x1b8   : > { %1607 = vmatmul.mubr.msk.f32.vlgmr.msra.gmra.mrb[4].mxu1 %vm629_vm1, %v1474_v51 }
 0x1b9   : > { %1609 = vmatprep.mubr.msk.f32.mxu1 %vm629_vm1, %v1475_v50 }
 0x1c0   : > { %v416_v52 = vpop.permute.xlu1 %415 }
 0x1c1   : > { %vm420_vm9 = vcmp.eq.s32.totalorder %v416_v52, %v380_v22 }
 0x1c2   : > { %v1476_v53 = vsel %vm420_vm9, 1.0, %v1987_v24 }
 0x1c3   : > { %1610 = vmatmul.mubr.msk.f32.gmra.mrb[6].mxu1 %vm629_vm1, %v1476_v53 }
 0x214   : > { %v1598_v58 = vpop.f32.mrb[2].mxu0 }
 0x215   : > { %v708_v59 = vpop.f32.mrb[3].mxu0 }
 0x218   : > { %v1601_v60 = vpop.f32.mrb[4].mxu0 }
 0x219   : > { %v718_v61 = vpop.f32.mrb[5].mxu0 }
 0x28b   : > { %v2240_v4 = vpop.f32.mrb[4].mxu1 }
 0x28c   : > { %v833_v5 = vmul.f32 %v2240_v4, %v1598_v58  ;;  %v2243_v6 = vpop.f32.mrb[5].mxu1 }
 0x28d   : > { %v832_v7 = vmul.f32 %v2243_v6, %v708_v59 }
 0x28e   : > { %v837_v8 = vmax.f32 %v833_v5, 0.0  ;;  %v869_v9 = vsub.f32 0.0, %v833_v5 }
 0x28f   : > { %v836_v10 = vmax.f32 %v832_v7, 0.0  ;;  %v868_v11 = vsub.f32 0.0, %v832_v7 }
 0x290   : > { %1791 = vrsqrt.f32 %v837_v8  ;;  %v873_v12 = vmax.f32 %v869_v9, 0.0  ;;  %vm849_vm10 = vcmp.eq.f32.partialorder %v837_v8, inf  ;;  %vm851_vm11 = vcmp.eq.f32.partialorder %v837_v8, 0.0 }
 0x291   : > { %1793 = vrsqrt.f32 %v836_v10  ;;  %v872_v13 = vmax.f32 %v868_v11, 0.0  ;;  %v852_v31 = vand.u32 2147483648, %v837_v8  ;;  %vm842_vm12 = vcmp.eq.f32.partialorder %v836_v10, inf }
 0x292   : > { %1795 = vrsqrt.f32 %v873_v12  ;;  %vm844_vm13 = vcmp.eq.f32.partialorder %v836_v10, 0.0  ;;  %v845_v35 = vand.u32 2147483648, %v836_v10  ;;  %vm885_vm14 = vcmp.eq.f32.partialorder %v873_v12, inf }
 0x293   : > { %1797 = vrsqrt.f32 %v872_v13  ;;  %v888_v37 = vand.u32 2147483648, %v873_v12  ;;  %vm887_vm15 = vcmp.eq.f32.partialorder %v873_v12, 0.0  ;;  %vm878_vm1 = vcmp.eq.f32.partialorder %v872_v13, inf }
 0x294   : > { %v881_v41 = vand.u32 2147483648, %v872_v13  ;;  %vm880_vm2 = vcmp.eq.f32.partialorder %v872_v13, 0.0 }
 0x296   : > { %v2246_v14 = vpop.f32.mrb[6].mxu1 }
 0x297   : > { %v835_v15 = vmul.f32 %v2246_v14, %v1601_v60  ;;  %v2249_v16 = vpop.f32.mrb[7].mxu1 }
 0x298   : > { %v834_v17 = vmul.f32 %v2249_v16, %v718_v61 }
 0x299   : > { %v2252_v18 = vmax.f32 %v835_v15, 0.0  ;;  %v871_v19 = vsub.f32 0.0, %v835_v15 }
 0x29a   : > { %v1792_v20 = vpop.eup %1791  ;;  %v2254_v22 = vmax.f32 %v834_v17, 0.0  ;;  %v870_v23 = vsub.f32 0.0, %v834_v17 }
 0x29b   : > { %v1794_v25 = vpop.eup %1793  ;;  %v848_v26 = vmul.f32 %v1792_v20, %v837_v8  ;;  %1799 = vrsqrt.f32 %v2252_v18  ;;  %v2257_v27 = vmax.f32 %v871_v19, 0.0  ;;  %vm863_vm4 = vcmp.eq.f32.partialorder %v2252_v18, inf }
 0x29c   : > { %1801 = vrsqrt.f32 %v2254_v22  ;;  %v2260_v28 = vmax.f32 %v870_v23, 0.0  ;;  %v841_v29 = vmul.f32 %v1794_v25, %v836_v10  ;;  %v1796_v30 = vpop.eup %1795  ;;  %vm856_vm3 = vcmp.eq.f32.partialorder %v2254_v22, inf }
 0x29d   : > { %1803 = vrsqrt.f32 %v2257_v27  ;;  %v1798_v32 = vpop.eup %1797  ;;  %v850_v33 = vsel %vm849_vm10, %v837_v8, %v848_v26  ;;  %v884_v34 = vmul.f32 %v1796_v30, %v873_v12  ;;  %vm858_vm5 = vcmp.eq.f32.partialorder %v2254_v22, 0.0 }
 0x29e   : > { %1805 = vrsqrt.f32 %v2260_v28  ;;  %v843_v38 = vsel %vm842_vm12, %v836_v10, %v841_v29  ;;  %v877_v39 = vmul.f32 %v1798_v32, %v872_v13  ;;  %v853_v43 = vsel %vm851_vm11, %v852_v31, %v850_v33 }
 0x29f   : > { %v886_v40 = vsel %vm885_vm14, %v873_v12, %v884_v34  ;;  %v846_v46 = vsel %vm844_vm13, %v845_v35, %v843_v38  ;;  %v859_v55 = vand.u32 2147483648, %v2254_v22  ;;  %vm892_vm6 = vcmp.eq.f32.partialorder %v2260_v28, inf }
 0x2a0   : > { %v879_v42 = vsel %vm878_vm1, %v872_v13, %v877_v39  ;;  %v889_v44 = vsel %vm887_vm15, %v888_v37, %v886_v40  ;;  %v866_v1 = vand.u32 2147483648, %v2252_v18  ;;  %vm899_vm7 = vcmp.eq.f32.partialorder %v2257_v27, inf }
 0x2a1   : > { %v882_v47 = vsel %vm880_vm2, %v881_v41, %v879_v42  ;;  %v905_v48 = vsub.f32 %v853_v43, %v889_v44  ;;  %v902_v7 = vand.u32 2147483648, %v2257_v27  ;;  %v895_v8 = vand.u32 2147483648, %v2260_v28  ;;  %v1477_v44 = vld [vmem:[%s349_s26] ss:$0 sm:$0xff] }
 0x2a2   : > { %v904_v50 = vsub.f32 %v846_v46, %v882_v47  ;;  %vm865_vm8 = vcmp.eq.f32.partialorder %v2252_v18, 0.0  ;;  %vm901_vm9 = vcmp.eq.f32.partialorder %v2257_v27, 0.0  ;;  %vm894_vm10 = vcmp.eq.f32.partialorder %v2260_v28, 0.0 }
 0x2a3   : > { %v909_v51 = vadd.f32 %v905_v48, %v616_v45  ;;  %v626_v13 = vadd.f32 %v2236_v56, %v1483_v36  ;;  %v430_v42 = vshrl.u32 %v379_v21, 7  ;;  %vm1077_vm13 = vcmask 523264  }
 0x2a4   : > { %v908_v53 = vadd.f32 %v904_v50, %v611_v49 }
 0x2a5   : > { %v1800_v52 = vpop.eup %1799  ;;  %v2269_v59 = vmax.f32 %v909_v51, 0.0  ;;  %v431_v47 = vadd.s32 8, %v430_v42  ;;  %vm436_vm11 = vcmp.eq.s32.totalorder %v430_v42, %v1477_v44 }
 0x2a6   : > { %v1802_v58 = vpop.eup %1801  ;;  %v862_v60 = vmul.f32 %v1800_v52, %v2252_v18  ;;  %v912_v61 = vmax.f32 %v908_v53, 0.0  ;;  %v1478_v49 = vsel %vm436_vm11, 1.0, %v1987_v24 }
 0x2a7   : > { %v1804_v54 = vpop.eup %1803  ;;  %v855_v62 = vmul.f32 %v1802_v58, %v2254_v22  ;;  %917 = vst.msk [vmem:[%s2277_s18 + $0x8] sm:$0xff] %vm446_vm0, %v2269_v59  ;;  %vm437_vm12 = vcmp.eq.s32.totalorder %v431_v47, %v1477_v44  ;;  %1634 = vmatprep.mubr.msk.f32.mxu1 %vm446_vm0, %v1478_v49 }
 0x2a8   : > { %v1806_v63 = vpop.eup %1805  ;;  %v864_v0 = vsel %vm863_vm4, %v2252_v18, %v862_v60  ;;  %v898_v2 = vmul.f32 %v1804_v54, %v2257_v27  ;;  %916 = vst.msk [vmem:[%s2277_s18] sm:$0xff] %vm446_vm0, %v912_v61  ;;  %1620 = vmatprep.mubr.msk.f32.mxu0 %vm446_vm0, %v912_v61  ;;  %v621_v18 = vadd.f32 %v1483_v36, %v2238_v57 }
 0x2a9   : > { %v857_v3 = vsel %vm856_vm3, %v2254_v22, %v855_v62  ;;  %v891_v5 = vmul.f32 %v1806_v63, %v2260_v28  ;;  %1621 = vmatmul.mubr.msk.f32.vlgmr.msra.gmra.mrb[6].mxu0 %vm446_vm0, %v2269_v59  ;;  %v867_v11 = vsel %vm865_vm8, %v866_v1, %v864_v0 }
 0x2aa   : > { %v900_v9 = vsel %vm899_vm7, %v2257_v27, %v898_v2  ;;  %v860_v15 = vsel %vm858_vm5, %v859_v55, %v857_v3 }
 0x2ab   : > { %v893_v10 = vsel %vm892_vm6, %v2260_v28, %v891_v5  ;;  %v903_v12 = vsel %vm901_vm9, %v902_v7, %v900_v9 }
 0x2ac   : > { %v896_v17 = vsel %vm894_vm10, %v895_v8, %v893_v10  ;;  %v907_v19 = vsub.f32 %v867_v11, %v903_v12  ;;  %v1479_v12 = vsel %vm437_vm12, 1.0, %v1987_v24 }
 0x2ad   : > { %v906_v20 = vsub.f32 %v860_v15, %v896_v17  ;;  %v377_v15 = vld [vmem:[#allocation5 + $0x80] sm:$0xff]  ;;  %v378_v17 = vld [vmem:[#allocation5 + $0x88] sm:$0xff] }
 0x2ae   : > { %v911_v23 = vadd.f32 %v907_v19, %v626_v13  ;;  %v1692_v19 = vpack.c.bf16 %v378_v17, %v377_v15 }
 0x2af   : > { %v910_v25 = vadd.f32 %v906_v20, %v621_v18 }
 0x2b0   : > { %v915_v26 = vmax.f32 %v911_v23, 0.0 }
 0x2b1   : > { %v914_v27 = vmax.f32 %v910_v25, 0.0 }
 0x2b2   : > { %919 = vst.msk [vmem:[%s2277_s18 + $0x18] sm:$0xff] %vm446_vm0, %v915_v26 }
 0x2b3   : > { %918 = vst.msk [vmem:[%s2277_s18 + $0x10] sm:$0xff] %vm446_vm0, %v914_v27  ;;  %1623 = vmatprep.mubr.msk.f32.mxu0 %vm446_vm0, %v914_v27 }
 0x2b4   : > { %1624 = vmatmul.mubr.msk.f32.gmra.mrb[8].mxu0 %vm446_vm0, %v915_v26 }
 0x37c   : > { %v1622_v56 = vpop.f32.mrb[6].mxu0 }
 0x37d   : > { %v1501_v22 = vclamps-f32 %v1622_v56, 5.0  ;;  %v998_v28 = vpop.f32.mrb[7].mxu0 }
 0x37e   : > { %v1500_v29 = vclamps-f32 %v998_v28, 5.0 }
 0x37f   : > { %v1027_v30 = vmul.f32 1.442695, %v1501_v22 }
 0x380   : > { %v1025_v31 = vmul.f32 1.442695, %v1500_v29 }
 0x381   : > { %1807 = vpow2.f32 %v1027_v30 }
 0x382   : > { %1809 = vpow2.f32 %v1025_v31 }
 0x387   : > { %v1625_v57 = vpop.f32.mrb[8].mxu0 }
 0x388   : > { %v1503_v32 = vclamps-f32 %v1625_v57, 5.0  ;;  %v1008_v33 = vpop.f32.mrb[9].mxu0 }
 0x389   : > { %v1502_v34 = vclamps-f32 %v1008_v33, 5.0 }
 0x38a   : > { %v1031_v35 = vmul.f32 1.442695, %v1503_v32 }
 0x38b   : > { %v1029_v36 = vmul.f32 1.442695, %v1502_v34  ;;  %v1808_v37 = vpop.eup %1807 }
 0x38c   : > { %1811 = vpow2.f32 %v1031_v35  ;;  %v1810_v38 = vpop.eup %1809  ;;  %1039 = vrot.lane.b32.xlu0 %v1808_v37, %s1989_s7  ;;  %v1054_v39 = vmul.f32 %v1808_v37, %v2269_v59 }
 0x38d   : > { %1813 = vpow2.f32 %v1029_v36  ;;  %1037 = vrot.lane.b32.xlu1 %v1810_v38, %s1989_s7  ;;  %v1053_v40 = vmul.f32 %v1810_v38, %v912_v61 }
 0x38f   : > { %v1780_v41 = vpack.i.bf16 %v1054_v39, %v1053_v40 }
 0x391   : > { %1781 = vrot.lane.b32.xlu1 %v1780_v41, %s1990_s11 }
 0x396   : > { %v1812_v43 = vpop.eup %1811 }
 0x397   : > { %v1814_v45 = vpop.eup %1813  ;;  %1043 = vrot.lane.b32.xlu1 %v1812_v43, %s1989_s7  ;;  %v1056_v46 = vmul.f32 %v1812_v43, %v915_v26 }
 0x398   : > { %1041 = vrot.lane.b32.xlu0 %v1814_v45, %s1989_s7  ;;  %v1055_v48 = vmul.f32 %v1814_v45, %v914_v27  ;;  %s1991_s7 = smov [#allocation8]  }
 0x39a   : > { %v1785_v50 = vpack.i.bf16 %v1056_v46, %v1055_v48 }
 0x39c   : > { %1786 = vrot.lane.b32.xlu0 %v1785_v50, %s1990_s11 }
 0x3fe   : > { %v1040_v51 = vpop.permute.xlu0 %1039 }
 0x3ff   : > { %v1038_v52 = vpop.permute.xlu1 %1037  ;;  %v1050_v21 = vmul.f32 %v2240_v4, %v1040_v51 }
 0x400   : > { %v1049_v53 = vmul.f32 %v1038_v52, %v2243_v6 }
 0x401   : > { %v1074_v54 = vsel %vm446_vm0, %v1808_v37, %v1050_v21 }
 0x402   : > { %v1073_v61 = vsel %vm446_vm0, %v1810_v38, %v1049_v53 }
 0x403   : > { %v1782_v58 = vpop.permute.xlu1 %1781 }
 0x404   : > { %v1784_v59 = vunpack.i.h.bf16 %v1782_v58  ;;  %v1783_v60 = vunpack.i.l.bf16 %v1782_v58 }
 0x406   : > { %v1078_v62 = vsel %vm1077_vm13, %v1073_v61, %v1783_v60  ;;  %v1079_v55 = vsel %vm1077_vm13, %v1074_v54, %v1784_v59 }
 0x407   : > { %v1680_v63 = vpack.c.bf16 %v1079_v55, %v1078_v62 }
 0x409   : > { %v1044_v0 = vpop.permute.xlu1 %1043  ;;  %1681 = vmatprep.subr.bf16.mxu1 %v1680_v63 }
 0x40a   : > { %v1042_v1 = vpop.permute.xlu0 %1041  ;;  %1683 = vmatpush3.bf16.msra.mxu1 %v1680_v63  ;;  %v1052_v4 = vmul.f32 %v2246_v14, %v1044_v0  ;;  %v375_v14 = vld [vmem:[#allocation5 + $0x70] sm:$0xff] }
 0x40b   : > { %v1051_v6 = vmul.f32 %v1042_v1, %v2249_v16  ;;  %v376_v16 = vld [vmem:[#allocation5 + $0x78] sm:$0xff] }
 0x40c   : > { %v1076_v7 = vsel %vm446_vm0, %v1812_v43, %v1052_v4  ;;  %v1688_v13 = vpack.c.bf16 %v376_v16, %v375_v14 }
 0x40d   : > { %v1075_v8 = vsel %vm446_vm0, %v1814_v45, %v1051_v6 }
 0x40e   : > { %v1787_v2 = vpop.permute.xlu0 %1786  ;;  %1689 = vmatprep.subr.bf16.mxu0 %v1688_v13 }
 0x40f   : > { %v1789_v3 = vunpack.i.h.bf16 %v1787_v2  ;;  %v1788_v5 = vunpack.i.l.bf16 %v1787_v2  ;;  %1691 = vmatpush3.bf16.msra.mxu0 %v1688_v13 }
 0x410   : > { %1693 = vmatprep.subr.bf16.mxu0 %v1692_v19 }
 0x411   : > { %v1080_v9 = vsel %vm1077_vm13, %v1075_v8, %v1788_v5  ;;  %v1081_v10 = vsel %vm1077_vm13, %v1076_v7, %v1789_v3 }
 0x412   : > { %v1684_v11 = vpack.c.bf16 %v1081_v10, %v1080_v9 }
 0x413   : > { %1695 = vmatpush3.bf16.msra.mxu0 %v1692_v19 }
 0x414   : > { %1685 = vmatprep.subr.bf16.mxu1 %v1684_v11 }
 0x415   : > { %1687 = vmatpush3.bf16.msra.mxu1 %v1684_v11 }
 0x418   : > { %1635 = vmatmul.mubr.msk.f32.vlgmr.msra.gmra.mrb[8].mxu1 %vm446_vm0, %v1479_v12 }
 0x4eb   : > { %v1636_v18 = vpop.f32.mrb[8].mxu1 }
 0x4ec   : > { %1179 = vrot.lane.b32.xlu0 %v1636_v18, %s1990_s11  ;;  %v1154_v20 = vpop.f32.mrb[9].mxu1  ;;  %v1164_v23 = vadd.f32 1e-16, %v1636_v18 }
 0x4ed   : > { %1177 = vrot.lane.b32.xlu1 %v1154_v20, %s1990_s11  ;;  %v1163_v24 = vadd.f32 1e-16, %v1154_v20  ;;  %s1881_s11 = sshll.u32 %s1991_s7, 4  ;;  %s1882_s11 = int_to_ptr.vmem [resolvable:$false] %s1881_s11 }
 0x4ee   : > { %s1883_s20 = scalar_lea.vmem %s1882_s11, 1024  ;;  %p1884_p13 = scmp.lt.s32.totalorder %s2351_s8, %s1882_s11 }
 0x4ef   : > { %1815 = vrcp.f32 %v1163_v24  ;;  %p1885_p3 = scmp.lt.s32.totalorder %s1883_s20, %s1877_s16 }
 0x4f0   : > { %1171 = vrot.lane.b32.xlu0 %v1636_v18, %s1988_s15  ;;  %1817 = vrcp.f32 %v1164_v23 }
 0x4f1   : > { %1169 = vrot.lane.b32.xlu1 %v1154_v20, %s1988_s15  ;;  %s1276_s15 = scalar_lea.sflag [#allocation9], %s2175_s12  ;;  %p1886_p7 = por %p1885_p3, %p1884_p13 }
 0x4f3   : > { %p1887_p9 = pnand %p1886_p7, %p1880_p10 }
 0x4f9   : > { %v1816_v26 = vpop.eup %1815 }
 0x4fa   : > { %v1818_v56 = vpop.eup %1817 }
 0x55e   : > { %v1180_v25 = vpop.permute.xlu0 %1179 }
 0x55f   : > { %v1178_v27 = vpop.permute.xlu1 %1177  ;;  %v1184_v28 = vmul.f32 %v1818_v56, %v1180_v25 }
 0x560   : > { %v1183_v22 = vmul.f32 %v1816_v26, %v1178_v27 }
 0x562   : > { %1645 = vmatprep.mubr.msk.f32.mxu0 %vm446_vm0, %v1183_v22 }
 0x563   : > { %1646 = vmatmul.mubr.msk.f32.vlgmr.msra.gmra.mrb[10].mxu0 %vm446_vm0, %v1184_v28 }
 0x564   : > { %1890 = shalt.err (!%p1887_p9)
}
 0x565   : > { %s1891_s18 = scalar_lea.hbm %s2348_s30, 512  ;;  %s1895_s29 = scalar_lea.hbm %s2443_s6, 1024 }
 0x566   : > { %p1892_p1 = scmp.ne.s32.totalorder %s2348_s30, %s1891_s18  ;;  %p1896_p11 = scmp.lt.u32.totalorder %s2348_s30, %s2443_s6 }
 0x567   : > { %p1897_p2 = scmp.lt.u32.totalorder %s1895_s29, %s1891_s18  ;;  %p1899_p6 = scmp.lt.u32.totalorder %s1891_s18, %s2348_s30 }
 0x568   : > { %p1893_p0 = pnand %p1892_p1, %p2124_p12 }
 0x569   : > { %p1898_p4 = por %p1897_p2, %p1896_p11 }
 0x56a   : > { %p1894_p5 = pneg %p1893_p0 }
 0x56b   : > { %p1900_p8 = por %p1899_p6, %p1898_p4 }
 0x56d   : > { %p1901_p10 = pnand %p1900_p8, %p1894_p5 }
 0x56f   : > { %1904 = shalt.err (!%p1901_p10)
}
 0x570   : > { %s1992_s16 = smov 128   ;;  %s1993_s7 = smov 8   ;;  %v1172_v29 = vpop.permute.xlu0 %1171  ;;  %v1170_v30 = vpop.permute.xlu1 %1169 }
 0x571   : > { %1703 = dma.vmem_to_hbm [thread:$0]  (%p2124_p12), %s2351_s8, 512, %s2348_s30, %s1276_s15, %s1992_s16, %s1992_s16, %s1993_s7   ;;  %v1176_v31 = vmul.f32 %v1818_v56, %v1172_v29  ;;  %v1175_v57 = vmul.f32 %v1816_v26, %v1170_v30 }
 0x572   : > { %s329_s11 = scalar_lea.vmem [#allocation7], %s1461_s17  ;;  %s1519_s18 = sshll.u32 %s2051_s25, 8 }
 0x573   : > { %s1289_s20 = sshll.u32 %s329_s11, 4  ;;  %s2388_s15 = scalar_lea.hbm %s2442_s5, %s1519_s18  ;;  %s2383_s20 = int_to_ptr.vmem [resolvable:$true] %s1289_s20 }
 0x574   : > { %s1271_s25 = scalar_lea.sflag [#allocation4], %s2175_s12  ;;  %s1905_s17 = scalar_lea.vmem %s2383_s20, 256 }
 0x575   : > { %p1906_p13 = scmp.ne.s32.totalorder %s2383_s20, %s1905_s17  ;;  %s1994_s27 = smov [#allocation7]  }
 0x576   : > { %s1909_s26 = sshll.u32 %s1994_s27, 4  ;;  %s1910_s26 = int_to_ptr.vmem [resolvable:$false] %s1909_s26 }
 0x577   : > { %p1907_p3 = pnand %p1906_p13, %p2124_p12  ;;  %s1911_s29 = scalar_lea.vmem %s1910_s26, 512 }
 0x578   : > { %p1912_p9 = scmp.lt.s32.totalorder %s2383_s20, %s1910_s26  ;;  %p1913_p1 = scmp.lt.s32.totalorder %s1911_s29, %s1905_s17 }
 0x579   : > { %p1908_p7 = pneg %p1907_p3 }
 0x57a   : > { %p1914_p0 = por %p1913_p1, %p1912_p9 }
 0x57c   : > { %p1915_p5 = pnand %p1914_p0, %p1908_p7 }
 0x636   : > { %v1647_v32 = vpop.f32.mrb[10].mxu0 }
 0x637   : > { %v1267_v33 = vadd.f32 %v1647_v32, %v1176_v31  ;;  %v1257_v34 = vpop.f32.mrb[11].mxu0 }
 0x638   : > { %v1266_v35 = vadd.f32 %v1257_v34, %v1175_v57 }
 0x639   : > { %1269 = vst.msk [vmem:[%s329_s11 + $0x8] sm:$0xff] %vm446_vm0, %v1267_v33 }
 0x63a   : > { %1268 = vst.msk [vmem:[%s329_s11] sm:$0xff] %vm446_vm0, %v1266_v35 }
 0x63b   : > { %1918 = shalt.err (!%p1915_p5)
}
 0x63c   : > { %s1919_s19 = scalar_lea.hbm %s2388_s15, 256  ;;  %s1923_s18 = scalar_lea.hbm %s2442_s5, 512 }
 0x63d   : > { %p1920_p11 = scmp.ne.s32.totalorder %s2388_s15, %s1919_s19  ;;  %p1924_p6 = scmp.lt.u32.totalorder %s2388_s15, %s2442_s5 }
 0x63e   : > { %p1925_p8 = scmp.lt.u32.totalorder %s1923_s18, %s1919_s19  ;;  %p1927_p13 = scmp.lt.u32.totalorder %s1919_s19, %s2388_s15 }
 0x63f   : > { %p1921_p2 = pnand %p1920_p11, %p2124_p12 }
 0x640   : > { %p1926_p10 = por %p1925_p8, %p1924_p6 }
 0x641   : > { %p1922_p4 = pneg %p1921_p2 }
 0x642   : > { %p1928_p3 = por %p1927_p13, %p1926_p10 }
 0x644   : > { %p1929_p7 = pnand %p1928_p3, %p1922_p4 }
 0x646   : > { %1932 = shalt.err (!%p1929_p7)
}
 0x647   : > { %1702 = dma.vmem_to_hbm [thread:$0]  (%p2124_p12), %s2383_s20, 256, %s2388_s15, %s1271_s25, %s1992_s16, %s1992_s16, %s1993_s7  }
 0x648 PF: > { %s1320_s17 = sand.u32 1, %s1967_s21   ;;  %p2458_p9 = scmp.ne.s32.totalorder %s2448_s28, 0 }
 0x649   : > { %p2459_p1 = scmp.ge.s32.totalorder %s1979_s24, 2  ;;  %s1321_s27 = scalar_lea.sflag [#allocation4], %s1320_s17 }
 0x64b   : > { %p1715_p0 = pnand %p2459_p1, %p2458_p9 }
 0x64d   : > { %1958 = dma.done.wait (!%p1715_p0), %s1321_s27, 256  }
 0x64e   : > { %1960 = vsyncadd (!%p1715_p0), %s1321_s27, 4294967040  ;;  %s1330_s14 = scalar_lea.sflag [#allocation9], %s1320_s17 }
 0x64f   : > { %1962 = dma.done.wait (!%p1715_p0), %s1330_s14, 512  }
 0x650   : > { %1964 = vsyncadd (!%p1715_p0), %s1330_s14, 4294966784  ;;  %p24_p12 = scmp.ge.s32.totalorder %s2086_s9, 4   ;;  %s2460_s21 = smov %s1971_s22 }
 0x651   : > { %s2461_s22 = smov %s1975_s23  ;;  %s2462_s23 = smov %s2120_s13 }
 0x652   : > { %s2463_s24 = smov %s2086_s9  ;;  %26 = sbr.rel (!%p24_p12) target bundleno = 8 (0x8), region = 115 }
 0x659   :  { %1335 = vsyncpa [#allocation3], 1 }
 0x65a   :  { %1337 = vsyncpa [#allocation3 + $0x1], 1 }
 0x65b   :  { %1338 = vsyncpa [#allocation6], 1 }
 0x65c   :  { %1339 = vsyncpa [#allocation4], 1 }
 0x65d   :  { %1341 = vsyncpa [#allocation4 + $0x1], 1 }
 0x65e   :  { %1342 = vsyncpa [#allocation9], 1 }
 0x65f   :  { %1344 = vsyncpa [#allocation9 + $0x1], 1 }

</bundles_post_ra>
